<compile_context>
chip_gen: v7x
topology: tpu7x:2x2x1
jax: 0.10.0
libtpu: 0.0.40
codegen_flags: <defaults>
</compile_context>

<pallas_src>
import math

import jax
import jax.numpy as jnp
from jax import lax
from jax.experimental import pallas as pl
from jax.experimental.pallas import tpu as pltpu


def _cdiv(a, b):
    return -(-a // b)


def _rup(a, m):
    return _cdiv(a, m) * m


def downsample_forward(x_nchw, weight, bias, *, target_pixels=None):
    """Conv2d(Cin, Cout, kernel_size=4, stride=2, padding=1) forward.

    x_nchw : (N, Cin, H, W)    float32  (H, W even)
    weight : (Cout, Cin, 4, 4) float32  (PyTorch OIHW layout)
    bias   : (Cout,)           float32
    returns: (N, Cout, H//2, W//2) float32
    """
    N, Cin, H, W = x_nchw.shape
    Cout = weight.shape[0]
    assert weight.shape == (Cout, Cin, 4, 4)
    assert H % 2 == 0 and W % 2 == 0, "k=4/s=2/p=1 downsample expects even H, W"
    OH, OW = H // 2, W // 2
    OHp, OWp = OH + 1, OW + 1      # space-to-depth grid of the padded input
    C4 = 4 * Cin                   # channels after 2x2 space-to-depth
    K = 4 * C4                     # contraction size of the fused tap dot

    # ---- VMEM-capacity-aware tile sizing (review #3/#7/#8/#9) ----------------
    try:
        vmem_cap = int(pltpu.get_tpu_info().vmem_capacity_bytes)
    except Exception:
        vmem_cap = 64 * 1024 * 1024                    # conservative (v7x)
    vmem_limit = max(32 * 1024 * 1024,
                     min(int(0.75 * vmem_cap), 100 * 1024 * 1024))
    budget = (vmem_limit * 3) // 4                     # slack for compiler temps
    if target_pixels is None:
        # 128-MiB parts (v5e/v6e) can afford larger tiles than v7x's 64 MiB.
        target_pixels = 65536 if vmem_cap >= 100 * 1024 * 1024 else 32768

    L = 8 // math.gcd(OW, 8)       # toh granularity: keeps toh*OW % 8 == 0

    def footprint(toh_):
        """Conservative per-step VMEM bytes incl. (sublane, lane) padding."""
        tm = toh_ * OW
        y_blk = (toh_ + 1) * _rup(OWp, 16) * _rup(C4, 128) * 2     # bf16 window
        o_blk = _rup(tm, 8) * _rup(Cout, 128) * 4                  # f32 out tile
        w_blk = _rup(K, 16) * _rup(Cout, 128) * 2                  # bf16 weights
        b_blk = 8 * 128 * 4                                        # f32 bias
        temps = (y_blk                                             # loaded block
                 + _rup(tm, 16) * _rup(K, 128) * 2                 # patch staging
                 + 2 * _rup(tm, 16) * _rup(C4, 128) * 2            # tap copies
                 + _rup(tm, 8) * _rup(Cout, 128) * 4)              # f32 dot result
        return 2 * (y_blk + o_blk + w_blk + b_blk) + temps         # dbl-buffered

    toh = max(L, (min(OH, max(1, _cdiv(target_pixels, OW))) // L) * L)
    while toh > L and footprint(toh) > budget:
        toh = max(L, ((toh // 2) // L) * L)

    # v7x has 2 TensorCores: keep >= 2 (ideally an even number of) grid steps.
    R = _cdiv(OH, toh)
    if N * R < 2 and toh > L:
        toh = max(L, ((toh // 2) // L) * L)
        R = _cdiv(OH, toh)
    if (N * R) % 2 == 1 and R < _cdiv(OH, L):
        cand = max(L, _rup(_cdiv(OH, R + 1), L))
        if _cdiv(OH, cand) % 2 == 0 and footprint(cand) <= budget:
            toh = cand
            R = _cdiv(OH, toh)
    OH_pad = R * toh
    TM = toh * OW                  # output pixels produced per grid step

    # ---- glue (input-sized): NCHW -> NHWC, pad, space-to-depth ---------------
    # Kept NCHW at the interface to match the module; a NHWC-native caller
    # could drop both transposes (review #10).
    x = jnp.transpose(x_nchw, (0, 2, 3, 1))                    # (N, H, W, Cin)
    x_pad = jnp.pad(x, ((0, 0), (1, 1), (1, 1), (0, 0)))       # padding = 1
    # y[n, i, j, (2*di+dj)*Cin + ci] = x_pad[n, 2i+di, 2j+dj, ci]
    y = (x_pad.reshape(N, OHp, 2, OWp, 2, Cin)
              .transpose(0, 1, 3, 2, 4, 5)
              .reshape(N, OHp, OWp, C4)
              .astype(jnp.bfloat16))
    rows_needed = OH_pad + 1
    if rows_needed > OHp:
        y = jnp.pad(y, ((0, 0), (0, rows_needed - OHp), (0, 0), (0, 0)))
    # Per-tile windows of toh+1 rows: only the single halo row is duplicated
    # instead of a full second shifted copy of the input.
    y_win = jnp.stack([y[:, r * toh: r * toh + toh + 1] for r in range(R)],
                      axis=1).reshape(N * R, toh + 1, OWp, C4)

    # ---- fused-tap weights: (K, Cout), row index t*C4 + (2*di+dj)*Cin + ci ---
    # tap index t = 2*da + db, kernel position (kh, kw) = (2*da + di, 2*db + dj)
    w = jnp.transpose(weight, (2, 3, 1, 0))        # (KH, KW, Cin, Cout)
    w = w.reshape(2, 2, 2, 2, Cin, Cout)           # (da, di, db, dj, ci, co)
    w = jnp.transpose(w, (0, 2, 1, 3, 4, 5))       # (da, db, di, dj, ci, co)
    w_k = w.reshape(K, Cout).astype(jnp.bfloat16)
    b_mat = bias.astype(jnp.float32).reshape(1, Cout)

    # ---- kernel: stage 4 taps into one (TM, K) LHS, one MXU dot, store -------
    def kernel(y_ref, w_ref, b_ref, o_ref):
        blk = y_ref[0]                             # (toh+1, OWp, C4) bf16
        cols = []
        for da in range(2):                        # tap row offset (static)
            for db in range(2):                    # tap col offset (static)
                cols.append(blk[da:da + toh, db:db + OW, :])
        patch = jnp.concatenate(cols, axis=-1).reshape(TM, K)   # lane-packed LHS
        res = jnp.dot(patch, w_ref[...], preferred_element_type=jnp.float32)
        o_ref[0] = (res + b_ref[...]).astype(o_ref.dtype)

    out_flat = pl.pallas_call(
        kernel,
        out_shape=jax.ShapeDtypeStruct((N * R, TM, Cout), jnp.float32),
        grid_spec=pltpu.PrefetchScalarGridSpec(
            num_scalar_prefetch=0,
            grid=(N * R,),
            in_specs=[
                pl.BlockSpec((1, toh + 1, OWp, C4), lambda g: (g, 0, 0, 0)),
                pl.BlockSpec((K, Cout), lambda g: (0, 0)),
                pl.BlockSpec((1, Cout), lambda g: (0, 0)),
            ],
            out_specs=pl.BlockSpec((1, TM, Cout), lambda g: (g, 0, 0)),
        ),
        compiler_params=pltpu.CompilerParams(
            dimension_semantics=("parallel",),
            vmem_limit_bytes=vmem_limit,
        ),
    )(y_win, w_k, b_mat)

    # (N*R, TM, Cout) -> (N, OH, OW, Cout) -> NCHW
    out = out_flat.reshape(N, OH_pad, OW, Cout)[:, :OH]
    return jnp.transpose(out, (0, 3, 1, 2))


if __name__ == "__main__":
    key = jax.random.PRNGKey(0)
    k_x, k_w, k_b = jax.random.split(key, 3)

    N, Cin, H, W = 2, 4, 16, 16
    Cout = 8

    x = jax.random.normal(k_x, (N, Cin, H, W), dtype=jnp.float32)
    fan_in = Cin * 4 * 4
    weight = jax.random.normal(k_w, (Cout, Cin, 4, 4), dtype=jnp.float32) / jnp.sqrt(fan_in)
    bias = jax.random.normal(k_b, (Cout,), dtype=jnp.float32) * 0.1

    fwd = jax.jit(downsample_forward)
    out = fwd(x, weight, bias)
    jax.block_until_ready(out)

    # Reference: identical bf16 operand rounding, f32 accumulation, via XLA conv.
    x_bf = x.astype(jnp.bfloat16).astype(jnp.float32)
    w_bf = weight.astype(jnp.bfloat16).astype(jnp.float32)
    ref = lax.conv_general_dilated(
        x_bf, w_bf,
        window_strides=(2, 2),
        padding=((1, 1), (1, 1)),
        dimension_numbers=("NCHW", "OIHW", "NCHW"),
        precision=lax.Precision.HIGHEST,
    ) + bias.reshape(1, Cout, 1, 1)

    assert out.shape == (N, Cout, H // 2, W // 2)
    assert jnp.allclose(out, ref, atol=1e-3, rtol=1e-3), float(jnp.max(jnp.abs(out - ref)))
    print("KERNEL_OK")
</pallas_src>

<mosaic_0001>
module attributes {stable_mosaic.version = 11 : i64} {
  func.func @kernel(%arg0: i32, %arg1: memref<1x9x9x16xbf16, #tpu.memory_space<vmem>>, %arg2: memref<64x8xbf16, #tpu.memory_space<vmem>>, %arg3: memref<1x8xf32, #tpu.memory_space<vmem>>, %arg4: memref<1x64x8xf32, #tpu.memory_space<vmem>>) attributes {dimension_semantics = [#tpu.dimension_semantics<parallel>], iteration_bounds = array<i64: 2>, scalar_prefetch = 0 : i64, scratch_operands = 0 : i64, tpu.core_type = #tpu.core_type<tc>, window_params = [{transform_indices = @transform_0, window_bounds = array<i64: 1, 9, 9, 16>}, {pipeline_mode = #tpu.pipeline_mode<synchronous>, transform_indices = @transform_1, window_bounds = array<i64: 64, 8>}, {pipeline_mode = #tpu.pipeline_mode<synchronous>, transform_indices = @transform_2, window_bounds = array<i64: 1, 8>}, {transform_indices = @transform_3, window_bounds = array<i64: 1, 64, 8>}]} {
    %c0 = arith.constant 0 : index
    %c0_0 = arith.constant 0 : index
    %c0_1 = arith.constant 0 : index
    %c0_2 = arith.constant 0 : index
    %0 = vector.load %arg1[%c0, %c0_0, %c0_1, %c0_2] : memref<1x9x9x16xbf16, #tpu.memory_space<vmem>>, vector<1x9x9x16xbf16>
    %1 = vector.shape_cast %0 : vector<1x9x9x16xbf16> to vector<9x9x16xbf16>
    %2 = vector.extract_strided_slice %1 {offsets = [0, 0, 0], sizes = [8, 8, 16], strides = [1, 1, 1]} : vector<9x9x16xbf16> to vector<8x8x16xbf16>
    %3 = vector.extract_strided_slice %1 {offsets = [0, 1, 0], sizes = [8, 8, 16], strides = [1, 1, 1]} : vector<9x9x16xbf16> to vector<8x8x16xbf16>
    %4 = vector.extract_strided_slice %1 {offsets = [1, 0, 0], sizes = [8, 8, 16], strides = [1, 1, 1]} : vector<9x9x16xbf16> to vector<8x8x16xbf16>
    %5 = vector.extract_strided_slice %1 {offsets = [1, 1, 0], sizes = [8, 8, 16], strides = [1, 1, 1]} : vector<9x9x16xbf16> to vector<8x8x16xbf16>
    %6 = tpu.concatenate %2, %3, %4, %5 in 2 : vector<8x8x16xbf16>, vector<8x8x16xbf16>, vector<8x8x16xbf16>, vector<8x8x16xbf16> -> vector<8x8x64xbf16>
    %7 = vector.shape_cast %6 : vector<8x8x64xbf16> to vector<64x64xbf16>
    %c0_3 = arith.constant 0 : index
    %c0_4 = arith.constant 0 : index
    %8 = vector.load %arg2[%c0_3, %c0_4] : memref<64x8xbf16, #tpu.memory_space<vmem>>, vector<64x8xbf16>
    %cst = arith.constant dense<0.000000e+00> : vector<64x8xf32>
    %9 = tpu.matmul %7, %8, %cst {dimension_numbers = #tpu.dot_dimension_numbers<[1], [0], [0], [1], [0, 0, 1, 1], [], []>} : vector<64x64xbf16>, vector<64x8xbf16>, vector<64x8xf32> -> vector<64x8xf32>
    %c0_5 = arith.constant 0 : index
    %c0_6 = arith.constant 0 : index
    %10 = vector.load %arg3[%c0_5, %c0_6] : memref<1x8xf32, #tpu.memory_space<vmem>>, vector<1x8xf32>
    %11 = vector.broadcast %10 : vector<1x8xf32> to vector<64x8xf32>
    %12 = arith.addf %9, %11 : vector<64x8xf32>
    %c0_7 = arith.constant 0 : index
    %c0_8 = arith.constant 0 : index
    %c0_9 = arith.constant 0 : index
    %13 = vector.load %arg4[%c0_7, %c0_8, %c0_9] : memref<1x64x8xf32, #tpu.memory_space<vmem>>, vector<1x64x8xf32>
    %14 = vector.shape_cast %13 : vector<1x64x8xf32> to vector<64x8xf32>
    %15 = vector.shape_cast %12 : vector<64x8xf32> to vector<1x64x8xf32>
    tpu.vector_store %arg4[%c0_7, %c0_8, %c0_9], %15 {strides = array<i32>} : memref<1x64x8xf32, #tpu.memory_space<vmem>>, vector<1x64x8xf32>,
    return
  }
  func.func @transform_0(%arg0: i32) -> (i32, i32, i32, i32) {
    %c0_i32 = arith.constant 0 : i32
    %c0_i32_0 = arith.constant 0 : i32
    %c0_i32_1 = arith.constant 0 : i32
    %c0_i32_2 = arith.constant 0 : i32
    return %arg0, %c0_i32, %c0_i32_0, %c0_i32_1 : i32, i32, i32, i32
  }
  func.func @transform_1(%arg0: i32) -> (i32, i32) {
    %c0_i32 = arith.constant 0 : i32
    %c0_i32_0 = arith.constant 0 : i32
    %c0_i32_1 = arith.constant 0 : i32
    return %c0_i32, %c0_i32_0 : i32, i32
  }
  func.func @transform_2(%arg0: i32) -> (i32, i32) {
    %c0_i32 = arith.constant 0 : i32
    %c0_i32_0 = arith.constant 0 : i32
    %c0_i32_1 = arith.constant 0 : i32
    return %c0_i32, %c0_i32_0 : i32, i32
  }
  func.func @transform_3(%arg0: i32) -> (i32, i32, i32) {
    %c0_i32 = arith.constant 0 : i32
    %c0_i32_0 = arith.constant 0 : i32
    %c0_i32_1 = arith.constant 0 : i32
    return %arg0, %c0_i32, %c0_i32_0 : i32, i32, i32
  }
}

</mosaic_0001>

<bundles_post_ra>
// kernel: downsample_forward.1
= control target key start
LH: loop header
LB: loop body
LE: loop exit
PB: predicated region body
PF: predicated region fallthrough
CT: control target
= control target key end

     0   :  { %s751_s12 = smov 0   ;;  %s913_s0 = inlined_call_operand.vmem [shape: bf16[2,9,9,16], index: 0, kind: input, shape index: {}]   ;;  %s914_s1 = inlined_call_operand.vmem [shape: bf16[64,8], index: 1, kind: input, shape index: {}]   ;;  %s915_s2 = inlined_call_operand.vmem [shape: f32[1,8], index: 2, kind: input, shape index: {}]   ;;  %s916_s3 = inlined_call_operand.vmem [shape: f32[2,64,8], index: 3, kind: output, shape index: {}]  }
   0x1 LB: > { %s614_s13 = sadd.s32 4294967295, %s726_s12   ;;  %p618_p0 = scmp.ge.s32.totalorder %s726_s12, 1  ;;  %s726_s12 = sphi %s751_s12, %s13_s12  }
   0x2   : > { %p137_p1 = scmp.lt.s32.totalorder %s726_s12, 3 }
   0x4   : > { %p138_p2 = pnand %p618_p0, %p137_p1 }
   0x5   : > { %p161_p3 = scmp.lt.s32.totalorder (!%p138_p2), %s614_s13, 1  ;;  %s728_s18 = smov (!%p138_p2), 32   ;;  %v716_v57 = vld [vmem:[%s914_s1] sm:$0xff] (!%p138_p2)   ;;  %v717_v60 = vld [vmem:[%s914_s1 + $0x8] sm:$0xff] (!%p138_p2)   ;;  %v718_v63 = vld [vmem:[%s914_s1 + $0x10] sm:$0xff] (!%p138_p2)   ;;  %vm354_vm0 = vcmask (!%p138_p2), 130048  }
   0x6   : > { %141 = sbr.rel (%p138_p2) target bundleno = 404 (0x194), region = 32  ;;  %s729_s19 = smov (!%p138_p2), 16   ;;  %663 = vmatprep.subr.bf16.mxu0 (!%p138_p2), %v716_v57  ;;  %679 = vmatprep.subr.bf16.mxu1 (!%p138_p2), %v716_v57  ;;  %vm379_vm1 = vcmask (!%p138_p2), 261120   ;;  %vm396_vm2 = vcmask (!%p138_p2), 392192   ;;  %vm472_vm3 = vcmask (!%p138_p2), 523264   ;;  %vm550_vm4 = vcmask (!%p138_p2), 64512  }
   0x7   : > { %664 = vmatpush3.bf16.msra.mxu0 (!%p138_p2), %v716_v57  ;;  %683 = vmatpush3.bf16.msra.mxu1 (!%p138_p2), %v716_v57  ;;  %s730_s28 = smov (!%p138_p2), 48  }
   0x8   : > { %665 = vmatprep.subr.bf16.mxu0 (!%p138_p2), %v717_v60  ;;  %680 = vmatprep.subr.bf16.mxu1 (!%p138_p2), %v717_v60 }
   0xb   : > { %666 = vmatpush3.bf16.msra.mxu0 (!%p138_p2), %v717_v60  ;;  %684 = vmatpush3.bf16.msra.mxu1 (!%p138_p2), %v717_v60 }
   0xc   : > { %667 = vmatprep.subr.bf16.mxu0 (!%p138_p2), %v718_v63  ;;  %681 = vmatprep.subr.bf16.mxu1 (!%p138_p2), %v718_v63 }
   0xd   : > { %s918_s13 = smov (!%p161_p3, %s614_s13), 1 }
   0xe   : > { %s687_s14 = smul.u32 72, %s918_s13  ;;  %s654_s29 = sshll.u32 %s918_s13, 6 }
   0xf   : > { %668 = vmatpush3.bf16.msra.mxu0 %v718_v63  ;;  %685 = vmatpush3.bf16.msra.mxu1 %v718_v63  ;;  %s170_s7 = scalar_lea.vmem %s916_s3, %s654_s29 }
  0x10   : > { %s765_s17 = scalar_lea.vmem %s913_s0, %s687_s14 }
  0x11   : > { %v768_v0 = vld [vmem:[%s765_s17 + $0x10] sm:$0xf]  ;;  %v177_v1 = vld [vmem:[%s765_s17 + $0x14] sm:$0x1]  ;;  %v772_v2 = vld [vmem:[%s765_s17 + $0x8] sm:$0xf] }
  0x12   : > { %v631_v3 = vcombine.low %v768_v0, %v768_v0  ;;  %v175_v4 = vld [vmem:[%s765_s17 + $0xc] sm:$0x1]  ;;  %v630_v5 = vcombine.low %v772_v2, %v772_v2  ;;  %v780_v6 = vld [vmem:[%s765_s17 + $0x20] sm:$0xf]  ;;  %v181_v7 = vld [vmem:[%s765_s17 + $0x24] sm:$0x1]  ;;  %v624_v8 = vcombine.low %v768_v0, %v177_v1 }
  0x13   : > { %v623_v9 = vcombine.low %v772_v2, %v175_v4  ;;  %v626_v10 = vcombine.low %v780_v6, %v181_v7  ;;  %v787_v11 = vld [vmem:[%s765_s17] sm:$0xf]  ;;  %v173_v12 = vld [vmem:[%s765_s17 + $0x4] sm:$0x1]  ;;  %v791_v13 = vld [vmem:[%s765_s17 + $0x28] sm:$0xf]  ;;  %v633_v62 = vcombine.low %v780_v6, %v780_v6 }
  0x14   : > { %314 = vrot.lane.b32.xlu1 %v631_v3, %s728_s18  ;;  %312 = vrot.lane.b32.xlu0 %v630_v5, %s728_s18  ;;  %v622_v14 = vcombine.low %v787_v11, %v173_v12  ;;  %v183_v15 = vld [vmem:[%s765_s17 + $0x2c] sm:$0x1]  ;;  %v798_v16 = vld [vmem:[%s765_s17 + $0x18] sm:$0xf]  ;;  %v247_v29 = vshll.u32 %v624_v8, 16  ;;  %v245_v47 = vshrl.u32 %v624_v8, 16  ;;  %v634_v61 = vcombine.low %v791_v13, %v791_v13 }
  0x15   : > { %v259_v17 = vshrl.u32 %v626_v10, 16  ;;  %v261_v18 = vshll.u32 %v626_v10, 16  ;;  %v627_v19 = vcombine.low %v791_v13, %v183_v15  ;;  %v179_v20 = vld [vmem:[%s765_s17 + $0x1c] sm:$0x1]  ;;  %v240_v23 = vshll.u32 %v623_v9, 16 }
  0x16   : > { %v231_v21 = vshrl.u32 %v622_v14, 16  ;;  %v233_v22 = vshll.u32 %v622_v14, 16  ;;  %v625_v24 = vcombine.low %v798_v16, %v179_v20  ;;  %v804_v25 = vld [vmem:[%s765_s17 + $0x38] sm:$0xf]  ;;  %v187_v30 = vld [vmem:[%s765_s17 + $0x3c] sm:$0x1]  ;;  %v632_v1 = vcombine.low %v798_v16, %v798_v16 }
  0x17   : > { %v263_v26 = vrot.slane %v261_v18, 1  ;;  %v266_v27 = vshrl.u32 %v627_v19, 16  ;;  %v268_v28 = vshll.u32 %v627_v19, 16  ;;  %v238_v32 = vshrl.u32 %v623_v9, 16  ;;  %v808_v35 = vld [vmem:[%s765_s17 + $0x30] sm:$0xf] }
  0x18   : > { %v235_v31 = vrot.slane %v233_v22, 1  ;;  %v242_v33 = vrot.slane %v240_v23, 1  ;;  %v254_v34 = vshll.u32 %v625_v24, 16  ;;  %v629_v38 = vcombine.low %v804_v25, %v187_v30  ;;  %v185_v39 = vld [vmem:[%s765_s17 + $0x34] sm:$0x1]  ;;  %v719_v5 = vld [vmem:[%s914_s1 + $0x18] sm:$0xff]  }
  0x19   : > { %v810_v36 = vor.u32 %v263_v26, %v259_v17  ;;  %v270_v37 = vrot.slane %v268_v28, 1  ;;  %v628_v41 = vcombine.low %v808_v35, %v185_v39  ;;  %v252_v43 = vshrl.u32 %v625_v24, 16  ;;  %v188_v3 = vld [vmem:[%s765_s17 + $0x40] sm:$0xf]  ;;  %v189_v7 = vld [vmem:[%s765_s17 + $0x44] sm:$0x1]  ;;  %669 = vmatprep.subr.bf16.mxu0 %v719_v5  ;;  %682 = vmatprep.subr.bf16.mxu1 %v719_v5 }
  0x1a   : > { %v236_v40 = vor.u32 %v235_v31, %v231_v21  ;;  %v256_v44 = vrot.slane %v254_v34, 1  ;;  %v282_v45 = vshll.u32 %v629_v38, 16  ;;  %v243_v46 = vor.u32 %v242_v33, %v238_v32  ;;  %670 = vmatpush3.bf16.msra.mxu0 %v719_v5  ;;  %686 = vmatpush3.bf16.msra.mxu1 %v719_v5 }
  0x1b   : > { %294 = vrot.lane.b32.xlu1 %v810_v36, %s729_s19  ;;  %v817_v42 = vor.u32 %v270_v37, %v266_v27  ;;  %v249_v48 = vrot.slane %v247_v29, 1  ;;  %v275_v49 = vshll.u32 %v628_v41, 16  ;;  %v280_v51 = vshrl.u32 %v629_v38, 16 }
  0x1c   : > { %286 = vrot.lane.b32.xlu0 %v236_v40, %s729_s19  ;;  %v257_v50 = vor.u32 %v256_v44, %v252_v43  ;;  %v284_v52 = vrot.slane %v282_v45, 1  ;;  %v273_v54 = vshrl.u32 %v628_v41, 16  ;;  %v635_v59 = vcombine.low %v808_v35, %v808_v35 }
  0x1d   : > { %v250_v53 = vor.u32 %v249_v48, %v245_v47  ;;  %v277_v55 = vrot.slane %v275_v49, 1  ;;  %v637_v4 = vcombine.low %v188_v3, %v188_v3  ;;  %v636_v8 = vcombine.low %v804_v25, %v804_v25 }
  0x1e   : > { %v285_v56 = vor.u32 %v284_v52, %v280_v51  ;;  %v638_v9 = vcombine.low %v188_v3, %v189_v7 }
  0x1f   : > { %296 = vrot.lane.b32.xlu1 %v817_v42, %s729_s19  ;;  %v278_v58 = vor.u32 %v277_v55, %v273_v54 }
  0x20   : > { %288 = vrot.lane.b32.xlu0 %v243_v46, %s729_s19  ;;  %v334_v10 = vshll.u32 %v638_v9, 16  ;;  %v332_v12 = vshrl.u32 %v638_v9, 16 }
  0x22   : > { %v336_v14 = vrot.slane %v334_v10, 1 }
  0x23   : > { %292 = vrot.lane.b32.xlu1 %v257_v50, %s729_s19 }
  0x24   : > { %290 = vrot.lane.b32.xlu0 %v250_v53, %s729_s19  ;;  %v337_v15 = vor.u32 %v336_v14, %v332_v12 }
  0x27   : > { %300 = vrot.lane.b32.xlu1 %v285_v56, %s729_s19 }
  0x28   : > { %298 = vrot.lane.b32.xlu0 %v278_v58, %s729_s19 }
  0x2b   : > { %322 = vrot.lane.b32.xlu1 %v635_v59, %s728_s18 }
  0x2c   : > { %320 = vrot.lane.b32.xlu0 %v634_v61, %s728_s18 }
  0x2f   : > { %318 = vrot.lane.b32.xlu1 %v633_v62, %s728_s18 }
  0x30   : > { %316 = vrot.lane.b32.xlu0 %v632_v1, %s728_s18 }
  0x33   : > { %326 = vrot.lane.b32.xlu1 %v637_v4, %s728_s18 }
  0x34   : > { %324 = vrot.lane.b32.xlu0 %v636_v8, %s728_s18 }
  0x37   : > { %340 = vrot.lane.b32.xlu1 %v250_v53, %s730_s28 }
  0x38   : > { %338 = vrot.lane.b32.xlu0 %v243_v46, %s730_s28 }
  0x3b   : > { %348 = vrot.lane.b32.xlu1 %v278_v58, %s730_s28 }
  0x3c   : > { %346 = vrot.lane.b32.xlu0 %v817_v42, %s730_s28 }
  0x3f   : > { %344 = vrot.lane.b32.xlu1 %v810_v36, %s730_s28 }
  0x40   : > { %342 = vrot.lane.b32.xlu0 %v257_v50, %s730_s28 }
  0x43   : > { %352 = vrot.lane.b32.xlu1 %v337_v15, %s730_s28 }
  0x44   : > { %350 = vrot.lane.b32.xlu0 %v285_v56, %s730_s28 }
  0x86   : > { %v315_v17 = vpop.permute.xlu1 %314  ;;  %v313_v18 = vpop.permute.xlu0 %312 }
  0x8d   : > { %v295_v19 = vpop.permute.xlu1 %294 }
  0x8e   : > { %v287_v20 = vpop.permute.xlu0 %286 }
  0x8f   : > { %v357_v36 = vsel %vm354_vm0, %v787_v11, %v287_v20  ;;  %v369_v11 = vsel %vm354_vm0, %v780_v6, %v295_v19 }
  0x90   : > { %v381_v40 = vsel %vm379_vm1, %v357_v36, %v313_v18 }
  0x91   : > { %v297_v21 = vpop.permute.xlu1 %296 }
  0x92   : > { %v289_v22 = vpop.permute.xlu0 %288 }
  0x93   : > { %v360_v33 = vsel %vm354_vm0, %v772_v2, %v289_v22  ;;  %v372_v2 = vsel %vm354_vm0, %v791_v13, %v297_v21 }
  0x94   : > { %v383_v38 = vsel %vm379_vm1, %v360_v33, %v315_v17 }
  0x95   : > { %v293_v23 = vpop.permute.xlu1 %292 }
  0x96   : > { %v291_v24 = vpop.permute.xlu0 %290  ;;  %v366_v50 = vsel %vm354_vm0, %v798_v16, %v293_v23 }
  0x97   : > { %v363_v51 = vsel %vm354_vm0, %v768_v0, %v291_v24 }
  0x99   : > { %v301_v26 = vpop.permute.xlu1 %300 }
  0x9a   : > { %v299_v27 = vpop.permute.xlu0 %298  ;;  %v378_v16 = vsel %vm354_vm0, %v804_v25, %v301_v26  ;;  %v639_v25 = vld [vmem:[%s915_s2] ss:$0 sm:$0xff] }
  0x9b   : > { %v375_v0 = vsel %vm354_vm0, %v808_v35, %v299_v27 }
  0x9d   : > { %v323_v28 = vpop.permute.xlu1 %322 }
  0x9e   : > { %v321_v29 = vpop.permute.xlu0 %320  ;;  %v391_v44 = vsel %vm379_vm1, %v372_v2, %v323_v28 }
  0x9f   : > { %v389_v46 = vsel %vm379_vm1, %v369_v11, %v321_v29 }
  0xa1   : > { %v319_v30 = vpop.permute.xlu1 %318 }
  0xa2   : > { %v317_v31 = vpop.permute.xlu0 %316  ;;  %v387_v6 = vsel %vm379_vm1, %v366_v50, %v319_v30 }
  0xa3   : > { %v385_v53 = vsel %vm379_vm1, %v363_v51, %v317_v31 }
  0xa5   : > { %v327_v32 = vpop.permute.xlu1 %326 }
  0xa6   : > { %v325_v34 = vpop.permute.xlu0 %324  ;;  %v395_v58 = vsel %vm379_vm1, %v378_v16, %v327_v32 }
  0xa7   : > { %v393_v60 = vsel %vm379_vm1, %v375_v0, %v325_v34 }
  0xa9   : > { %v341_v37 = vpop.permute.xlu1 %340 }
  0xaa   : > { %v400_v39 = vsel %vm396_vm2, %v383_v38, %v341_v37  ;;  %v339_v41 = vpop.permute.xlu0 %338 }
  0xab   : > { %v398_v42 = vsel %vm396_vm2, %v381_v40, %v339_v41 }
  0xac   : > { %v640_v43 = vcombine.low %v398_v42, %v400_v39 }
  0xad   : > { %v349_v45 = vpop.permute.xlu1 %348 }
  0xae   : > { %v408_v47 = vsel %vm396_vm2, %v391_v44, %v349_v45  ;;  %671 = vmatprep.mubr.msk.bf16.mxu0 %vm472_vm3, %v640_v43  ;;  %v347_v48 = vpop.permute.xlu0 %346 }
  0xaf   : > { %v406_v49 = vsel %vm396_vm2, %v389_v46, %v347_v48 }
  0xb0   : > { %v642_v13 = vcombine.low %v406_v49, %v408_v47 }
  0xb1   : > { %v345_v52 = vpop.permute.xlu1 %344 }
  0xb2   : > { %v404_v54 = vsel %vm396_vm2, %v387_v6, %v345_v52  ;;  %675 = vmatprep.mubr.msk.bf16.mxu1 %vm472_vm3, %v642_v13  ;;  %v343_v55 = vpop.permute.xlu0 %342 }
  0xb3   : > { %v402_v56 = vsel %vm396_vm2, %v385_v53, %v343_v55 }
  0xb4   : > { %v641_v57 = vcombine.low %v402_v56, %v404_v54 }
  0xb5   : > { %v353_v59 = vpop.permute.xlu1 %352 }
  0xb6   : > { %v412_v61 = vsel %vm396_vm2, %v395_v58, %v353_v59  ;;  %672 = vmatmul.mubr.msk.bf16.vlgmr.msra.gmra.mrb[0].mxu0 %vm472_vm3, %v641_v57  ;;  %v351_v62 = vpop.permute.xlu0 %350 }
  0xb7   : > { %v410_v63 = vsel %vm396_vm2, %v393_v60, %v351_v62 }
  0xb8   : > { %v643_v1 = vcombine.low %v410_v63, %v412_v61 }
  0xba   : > { %676 = vmatmul.mubr.msk.bf16.vlgmr.msra.gmra.mrb[0].mxu1 %vm472_vm3, %v643_v1 }
 0x189   : > { %v673_v35 = vpop.f32.mrb[0].mxu0 }
 0x18a   : > { %v528_v3 = vadd.f32 %v673_v35, %v639_v25  ;;  %v519_v4 = vpop.f32.mrb[1].mxu0 }
 0x18b   : > { %v520_v5 = vadd.f32 %v639_v25, %v519_v4  ;;  %v674_v7 = vpop.f32.mrb[2].mxu0 }
 0x18c   : > { %553 = vst.msk [vmem:[%s170_s7 + $0x10] sm:$0xff] %vm550_vm4, %v528_v3  ;;  %v531_v8 = vadd.f32 %v674_v7, %v639_v25  ;;  %v522_v9 = vpop.f32.mrb[3].mxu0 }
 0x18d   : > { %551 = vst.msk [vmem:[%s170_s7] sm:$0xff] %vm550_vm4, %v520_v5  ;;  %v523_v10 = vadd.f32 %v639_v25, %v522_v9  ;;  %v677_v12 = vpop.f32.mrb[0].mxu1 }
 0x18e   : > { %554 = vst.msk [vmem:[%s170_s7 + $0x18] sm:$0xff] %vm550_vm4, %v531_v8  ;;  %v544_v14 = vadd.f32 %v677_v12, %v639_v25  ;;  %v535_v15 = vpop.f32.mrb[1].mxu1 }
 0x18f   : > { %552 = vst.msk [vmem:[%s170_s7 + $0x8] sm:$0xff] %vm550_vm4, %v523_v10  ;;  %v536_v17 = vadd.f32 %v639_v25, %v535_v15  ;;  %v678_v18 = vpop.f32.mrb[2].mxu1 }
 0x190   : > { %557 = vst.msk [vmem:[%s170_s7 + $0x30] sm:$0xff] %vm550_vm4, %v544_v14  ;;  %v547_v19 = vadd.f32 %v678_v18, %v639_v25  ;;  %v538_v20 = vpop.f32.mrb[3].mxu1 }
 0x191   : > { %555 = vst.msk [vmem:[%s170_s7 + $0x20] sm:$0xff] %vm550_vm4, %v536_v17  ;;  %v539_v21 = vadd.f32 %v639_v25, %v538_v20 }
 0x192   : > { %558 = vst.msk [vmem:[%s170_s7 + $0x38] sm:$0xff] %vm550_vm4, %v547_v19 }
 0x193   : > { %556 = vst.msk [vmem:[%s170_s7 + $0x28] sm:$0xff] %vm550_vm4, %v539_v21 }
 0x194 PF: > { %s13_s12 = sadd.s32 1, %s726_s12  }
 0x195   : > { %p10_p4 = scmp.ge.s32.totalorder %s13_s12, 4  }
 0x197   :  { %12 = sbr.rel (!%p10_p4) target bundleno = 1 (0x1), region = 62 }

</bundles_post_ra>
